<compile_context>
chip_gen: v6e
topology: v6e:2x2x1
jax: 0.10.0
libtpu: 0.0.40
codegen_flags: <defaults>
</compile_context>

<pallas_src>
import jax
import jax.numpy as jnp
from jax.experimental import pallas as pl
from jax.experimental.pallas import tpu as pltpu


def _round_up(x, m):
    return ((x + m - 1) // m) * m


def cnn_kernel(x_ref, w1_ref, b1_ref, w2_ref, b2_ref,
               w3_ref, b3_ref, w4_ref, b4_ref, o_ref):
    # Feature-major layout: every activation is (C_out, TILE_B); the batch is
    # on the lane axis, so bias-add / relu / sigmoid and the final store are
    # all lane-dense.
    x = x_ref[...]                                                # (7, TB) bf16

    # conv1 (1x1) + relu : (16,7) @ (7,TB) -> (16,TB)   [pool1 = identity]
    h = jnp.dot(w1_ref[...], x, preferred_element_type=jnp.float32) + b1_ref[...]
    h = jnp.maximum(h, 0.0)

    # conv2 (1x1) + relu : (8,16) @ (16,TB) -> (8,TB)   [pool2 = identity]
    h = jnp.dot(w2_ref[...], h.astype(jnp.bfloat16),
                preferred_element_type=jnp.float32) + b2_ref[...]
    h = jnp.maximum(h, 0.0)
    # flatten of (N,8,1,1) -> (N,8): already the (8,TB) activation here.

    # fc1 + sigmoid : (128,8) @ (8,TB) -> (128,TB)
    h = jnp.dot(w3_ref[...], h.astype(jnp.bfloat16),
                preferred_element_type=jnp.float32) + b3_ref[...]
    h = jax.nn.sigmoid(h)

    # fc2 + sigmoid : (1,128) @ (128,TB) -> (1,TB)  (lane-dense output)
    h = jnp.dot(w4_ref[...], h.astype(jnp.bfloat16),
                preferred_element_type=jnp.float32) + b4_ref[...]
    o_ref[...] = jax.nn.sigmoid(h).astype(o_ref.dtype)


def cnn_forward(x_nchw, params, *, tile_b=512):
    """x_nchw: (N, 7, 1, 1) float32 -> (N, 1) float32, matching PyTorch CNN.forward."""
    n = x_nchw.shape[0]
    c_in = x_nchw.shape[1]
    w1, b1, w2, b2, w3, b3, w4, b4 = params

    # Cast the batch-scaling input and the weights to bf16 (f32 accumulation in
    # the kernel); biases stay f32.
    bf = lambda a: a.astype(jnp.bfloat16)
    w1, w2, w3, w4 = bf(w1), bf(w2), bf(w3), bf(w4)

    # NCHW (N,7,1,1) -> (N,7) -> feature-major (7,N), padded to a tile multiple.
    x_t = x_nchw.reshape(n, c_in).astype(jnp.bfloat16).T         # (7, N)
    tile_b = min(tile_b, _round_up(n, 128))                      # lane-aligned tile
    n_pad = _round_up(n, tile_b)
    if n_pad != n:
        x_t = jnp.pad(x_t, ((0, 0), (0, n_pad - n)))

    grid = (n_pad // tile_b,)
    weight_args = (w1, b1, w2, b2, w3, b3, w4, b4)
    # Weights/biases: block index never changes -> they stay resident in VMEM.
    resident = lambda a: pl.BlockSpec(a.shape, lambda i: (0, 0))

    flops = 2 * n_pad * (7 * 16 + 16 * 8 + 8 * 128 + 128 * 1)
    bytes_accessed = (x_t.size * 2 + n_pad * 4
                      + sum(int(a.size) * a.dtype.itemsize for a in weight_args))

    out = pl.pallas_call(
        cnn_kernel,
        out_shape=jax.ShapeDtypeStruct((1, n_pad), jnp.float32),
        grid=grid,
        in_specs=[pl.BlockSpec((c_in, tile_b), lambda i: (0, i))]
                 + [resident(a) for a in weight_args],
        out_specs=pl.BlockSpec((1, tile_b), lambda i: (0, i)),
        compiler_params=pltpu.CompilerParams(
            dimension_semantics=("parallel",)),
        cost_estimate=pl.CostEstimate(
            flops=flops,
            transcendentals=n_pad * (128 + 1),
            bytes_accessed=bytes_accessed),
    )(x_t, *weight_args)

    return out[0, :n].reshape(n, 1)


def init_params(key):
    """Deterministic synthetic parameters, same shapes as the PyTorch module.

    Weights are stored (out_features, in_features) = PyTorch layout (conv
    weights have their trailing 1x1 spatial dims squeezed); biases are (out, 1)
    columns for the feature-major kernel layout.
    """
    ks = jax.random.split(key, 8)

    def uni(k, shape, fan_in):
        bound = 1.0 / jnp.sqrt(fan_in)
        return jax.random.uniform(k, shape, jnp.float32, -bound, bound)

    w1 = uni(ks[0], (16, 7), 7)      # conv1.weight (16,7,1,1) squeezed
    b1 = uni(ks[1], (16, 1), 7)      # conv1.bias
    w2 = uni(ks[2], (8, 16), 16)     # conv2.weight (8,16,1,1) squeezed
    b2 = uni(ks[3], (8, 1), 16)      # conv2.bias
    w3 = uni(ks[4], (128, 8), 8)     # fc1.weight
    b3 = uni(ks[5], (128, 1), 8)     # fc1.bias
    w4 = uni(ks[6], (1, 128), 128)   # fc2.weight
    b4 = uni(ks[7], (1, 1), 128)     # fc2.bias
    return (w1, b1, w2, b2, w3, b3, w4, b4)


def cnn_forward_ref(x_nchw, params):
    """Pure-JAX f32 reference matching the PyTorch forward exactly."""
    w1, b1, w2, b2, w3, b3, w4, b4 = params
    n = x_nchw.shape[0]
    x = x_nchw.reshape(n, -1)
    h = jnp.maximum(x @ w1.T + b1.T, 0.0)
    h = jnp.maximum(h @ w2.T + b2.T, 0.0)
    h = jax.nn.sigmoid(h @ w3.T + b3.T)
    return jax.nn.sigmoid(h @ w4.T + b4.T)


if __name__ == "__main__":
    key = jax.random.PRNGKey(0)
    kx, kp = jax.random.split(key)

    batch = 2
    x = jax.random.normal(kx, (batch, 7, 1, 1), jnp.float32)   # NCHW, H=W=1
    params = init_params(kp)

    out = cnn_forward(x, params)
    out = jax.block_until_ready(out)

    ref = cnn_forward_ref(x, params)
    assert out.shape == (batch, 1)
    # bf16 weights/inputs with f32 accumulation -> ~1e-3 relative error budget.
    assert jnp.allclose(out, ref, atol=2e-2, rtol=2e-2)

    print("KERNEL_OK")
</pallas_src>

<mosaic_0001>
module attributes {stable_mosaic.version = 11 : i64} {
  func.func @cnn_kernel(%arg0: i32, %arg1: memref<7x128xbf16, #tpu.memory_space<vmem>>, %arg2: memref<16x7xbf16, #tpu.memory_space<vmem>>, %arg3: memref<16x1xf32, #tpu.memory_space<vmem>>, %arg4: memref<8x16xbf16, #tpu.memory_space<vmem>>, %arg5: memref<8x1xf32, #tpu.memory_space<vmem>>, %arg6: memref<128x8xbf16, #tpu.memory_space<vmem>>, %arg7: memref<128x1xf32, #tpu.memory_space<vmem>>, %arg8: memref<1x128xbf16, #tpu.memory_space<vmem>>, %arg9: memref<1x1xf32, #tpu.memory_space<vmem>>, %arg10: memref<1x128xf32, #tpu.memory_space<vmem>>) attributes {dimension_semantics = [#tpu.dimension_semantics<parallel>], iteration_bounds = array<i64: 1>, scalar_prefetch = 0 : i64, scratch_operands = 0 : i64, tpu.core_type = #tpu.core_type<tc>, window_params = [{transform_indices = @transform_0, window_bounds = array<i64: 7, 128>}, {pipeline_mode = #tpu.pipeline_mode<synchronous>, transform_indices = @transform_1, window_bounds = array<i64: 16, 7>}, {pipeline_mode = #tpu.pipeline_mode<synchronous>, transform_indices = @transform_2, window_bounds = array<i64: 16, 1>}, {pipeline_mode = #tpu.pipeline_mode<synchronous>, transform_indices = @transform_3, window_bounds = array<i64: 8, 16>}, {pipeline_mode = #tpu.pipeline_mode<synchronous>, transform_indices = @transform_4, window_bounds = array<i64: 8, 1>}, {pipeline_mode = #tpu.pipeline_mode<synchronous>, transform_indices = @transform_5, window_bounds = array<i64: 128, 8>}, {pipeline_mode = #tpu.pipeline_mode<synchronous>, transform_indices = @transform_6, window_bounds = array<i64: 128, 1>}, {pipeline_mode = #tpu.pipeline_mode<synchronous>, transform_indices = @transform_7, window_bounds = array<i64: 1, 128>}, {pipeline_mode = #tpu.pipeline_mode<synchronous>, transform_indices = @transform_8, window_bounds = array<i64: 1, 1>}, {transform_indices = @transform_9, window_bounds = array<i64: 1, 128>}]} {
    %c0 = arith.constant 0 : index
    %c0_0 = arith.constant 0 : index
    %0 = vector.load %arg1[%c0, %c0_0] : memref<7x128xbf16, #tpu.memory_space<vmem>>, vector<7x128xbf16>
    %c0_1 = arith.constant 0 : index
    %c0_2 = arith.constant 0 : index
    %1 = vector.load %arg2[%c0_1, %c0_2] : memref<16x7xbf16, #tpu.memory_space<vmem>>, vector<16x7xbf16>
    %cst = arith.constant dense<0.000000e+00> : vector<16x128xf32>
    %2 = tpu.matmul %1, %0, %cst {dimension_numbers = #tpu.dot_dimension_numbers<[1], [0], [0], [1], [0, 0, 1, 1], [], []>} : vector<16x7xbf16>, vector<7x128xbf16>, vector<16x128xf32> -> vector<16x128xf32>
    %c0_3 = arith.constant 0 : index
    %c0_4 = arith.constant 0 : index
    %3 = vector.load %arg3[%c0_3, %c0_4] : memref<16x1xf32, #tpu.memory_space<vmem>>, vector<16x1xf32>
    %4 = vector.broadcast %3 : vector<16x1xf32> to vector<16x128xf32>
    %5 = arith.addf %2, %4 : vector<16x128xf32>
    %cst_5 = arith.constant 0.000000e+00 : f32
    %6 = vector.broadcast %cst_5 : f32 to vector<16x128xf32>
    %7 = arith.maximumf %5, %6 : vector<16x128xf32>
    %c0_6 = arith.constant 0 : index
    %c0_7 = arith.constant 0 : index
    %8 = vector.load %arg4[%c0_6, %c0_7] : memref<8x16xbf16, #tpu.memory_space<vmem>>, vector<8x16xbf16>
    %9 = arith.truncf %7 : vector<16x128xf32> to vector<16x128xbf16>
    %cst_8 = arith.constant dense<0.000000e+00> : vector<8x128xf32>
    %10 = tpu.matmul %8, %9, %cst_8 {dimension_numbers = #tpu.dot_dimension_numbers<[1], [0], [0], [1], [0, 0, 1, 1], [], []>} : vector<8x16xbf16>, vector<16x128xbf16>, vector<8x128xf32> -> vector<8x128xf32>
    %c0_9 = arith.constant 0 : index
    %c0_10 = arith.constant 0 : index
    %11 = vector.load %arg5[%c0_9, %c0_10] : memref<8x1xf32, #tpu.memory_space<vmem>>, vector<8x1xf32>
    %12 = vector.broadcast %11 : vector<8x1xf32> to vector<8x128xf32>
    %13 = arith.addf %10, %12 : vector<8x128xf32>
    %cst_11 = arith.constant 0.000000e+00 : f32
    %14 = vector.broadcast %cst_11 : f32 to vector<8x128xf32>
    %15 = arith.maximumf %13, %14 : vector<8x128xf32>
    %c0_12 = arith.constant 0 : index
    %c0_13 = arith.constant 0 : index
    %16 = vector.load %arg6[%c0_12, %c0_13] : memref<128x8xbf16, #tpu.memory_space<vmem>>, vector<128x8xbf16>
    %17 = arith.truncf %15 : vector<8x128xf32> to vector<8x128xbf16>
    %cst_14 = arith.constant dense<0.000000e+00> : vector<128x128xf32>
    %18 = tpu.matmul %16, %17, %cst_14 {dimension_numbers = #tpu.dot_dimension_numbers<[1], [0], [0], [1], [0, 0, 1, 1], [], []>} : vector<128x8xbf16>, vector<8x128xbf16>, vector<128x128xf32> -> vector<128x128xf32>
    %c0_15 = arith.constant 0 : index
    %c0_16 = arith.constant 0 : index
    %19 = vector.load %arg7[%c0_15, %c0_16] : memref<128x1xf32, #tpu.memory_space<vmem>>, vector<128x1xf32>
    %20 = vector.broadcast %19 : vector<128x1xf32> to vector<128x128xf32>
    %21 = arith.addf %18, %20 : vector<128x128xf32>
    %22 = arith.negf %21 : vector<128x128xf32>
    %23 = math.exp %22 : vector<128x128xf32>
    %cst_17 = arith.constant 1.000000e+00 : f32
    %24 = vector.broadcast %cst_17 : f32 to vector<128x128xf32>
    %25 = arith.addf %24, %23 : vector<128x128xf32>
    %26 = arith.divf %24, %25 : vector<128x128xf32>
    %c0_18 = arith.constant 0 : index
    %c0_19 = arith.constant 0 : index
    %27 = vector.load %arg8[%c0_18, %c0_19] : memref<1x128xbf16, #tpu.memory_space<vmem>>, vector<1x128xbf16>
    %28 = arith.truncf %26 : vector<128x128xf32> to vector<128x128xbf16>
    %cst_20 = arith.constant dense<0.000000e+00> : vector<1x128xf32>
    %29 = tpu.matmul %27, %28, %cst_20 {dimension_numbers = #tpu.dot_dimension_numbers<[1], [0], [0], [1], [0, 0, 1, 1], [], []>} : vector<1x128xbf16>, vector<128x128xbf16>, vector<1x128xf32> -> vector<1x128xf32>
    %c0_21 = arith.constant 0 : index
    %c0_22 = arith.constant 0 : index
    %30 = vector.load %arg9[%c0_21, %c0_22] : memref<1x1xf32, #tpu.memory_space<vmem>>, vector<1x1xf32>
    %31 = vector.broadcast %30 : vector<1x1xf32> to vector<1x128xf32>
    %32 = arith.addf %29, %31 : vector<1x128xf32>
    %33 = arith.negf %32 : vector<1x128xf32>
    %34 = math.exp %33 : vector<1x128xf32>
    %cst_23 = arith.constant 1.000000e+00 : f32
    %35 = vector.broadcast %cst_23 : f32 to vector<1x128xf32>
    %36 = arith.addf %35, %34 : vector<1x128xf32>
    %37 = arith.divf %35, %36 : vector<1x128xf32>
    %c0_24 = arith.constant 0 : index
    %c0_25 = arith.constant 0 : index
    %38 = vector.load %arg10[%c0_24, %c0_25] : memref<1x128xf32, #tpu.memory_space<vmem>>, vector<1x128xf32>
    tpu.vector_store %arg10[%c0_24, %c0_25], %37 {strides = array<i32>} : memref<1x128xf32, #tpu.memory_space<vmem>>, vector<1x128xf32>,
    return
  }
  func.func @transform_0(%arg0: i32) -> (i32, i32) {
    %c0_i32 = arith.constant 0 : i32
    %c0_i32_0 = arith.constant 0 : i32
    return %c0_i32, %arg0 : i32, i32
  }
  func.func @transform_1(%arg0: i32) -> (i32, i32) {
    %c0_i32 = arith.constant 0 : i32
    %c0_i32_0 = arith.constant 0 : i32
    %c0_i32_1 = arith.constant 0 : i32
    return %c0_i32, %c0_i32_0 : i32, i32
  }
  func.func @transform_2(%arg0: i32) -> (i32, i32) {
    %c0_i32 = arith.constant 0 : i32
    %c0_i32_0 = arith.constant 0 : i32
    %c0_i32_1 = arith.constant 0 : i32
    return %c0_i32, %c0_i32_0 : i32, i32
  }
  func.func @transform_3(%arg0: i32) -> (i32, i32) {
    %c0_i32 = arith.constant 0 : i32
    %c0_i32_0 = arith.constant 0 : i32
    %c0_i32_1 = arith.constant 0 : i32
    return %c0_i32, %c0_i32_0 : i32, i32
  }
  func.func @transform_4(%arg0: i32) -> (i32, i32) {
    %c0_i32 = arith.constant 0 : i32
    %c0_i32_0 = arith.constant 0 : i32
    %c0_i32_1 = arith.constant 0 : i32
    return %c0_i32, %c0_i32_0 : i32, i32
  }
  func.func @transform_5(%arg0: i32) -> (i32, i32) {
    %c0_i32 = arith.constant 0 : i32
    %c0_i32_0 = arith.constant 0 : i32
    %c0_i32_1 = arith.constant 0 : i32
    return %c0_i32, %c0_i32_0 : i32, i32
  }
  func.func @transform_6(%arg0: i32) -> (i32, i32) {
    %c0_i32 = arith.constant 0 : i32
    %c0_i32_0 = arith.constant 0 : i32
    %c0_i32_1 = arith.constant 0 : i32
    return %c0_i32, %c0_i32_0 : i32, i32
  }
  func.func @transform_7(%arg0: i32) -> (i32, i32) {
    %c0_i32 = arith.constant 0 : i32
    %c0_i32_0 = arith.constant 0 : i32
    %c0_i32_1 = arith.constant 0 : i32
    return %c0_i32, %c0_i32_0 : i32, i32
  }
  func.func @transform_8(%arg0: i32) -> (i32, i32) {
    %c0_i32 = arith.constant 0 : i32
    %c0_i32_0 = arith.constant 0 : i32
    %c0_i32_1 = arith.constant 0 : i32
    return %c0_i32, %c0_i32_0 : i32, i32
  }
  func.func @transform_9(%arg0: i32) -> (i32, i32) {
    %c0_i32 = arith.constant 0 : i32
    %c0_i32_0 = arith.constant 0 : i32
    return %c0_i32, %arg0 : i32, i32
  }
}

</mosaic_0001>

<bundles_post_ra>
// kernel: tpu_custom_call.1
= control target key start
LH: loop header
LB: loop body
LE: loop exit
PB: predicated region body
PF: predicated region fallthrough
CT: control target
= control target key end

     0   :  { %s1022_s0 = inlined_call_operand.vmem [shape: bf16[7,128], index: 0, kind: input, shape index: {}]   ;;  %s1023_s1 = inlined_call_operand.vmem [shape: bf16[16,7], index: 1, kind: input, shape index: {}]   ;;  %s1024_s2 = inlined_call_operand.vmem [shape: f32[16,1], index: 2, kind: input, shape index: {}]   ;;  %s1025_s3 = inlined_call_operand.vmem [shape: bf16[8,16], index: 3, kind: input, shape index: {}]   ;;  %s1026_s4 = inlined_call_operand.vmem [shape: f32[8,1], index: 4, kind: input, shape index: {}]   ;;  %s1027_s5 = inlined_call_operand.vmem [shape: bf16[128,8], index: 5, kind: input, shape index: {}]   ;;  %s1028_s6 = inlined_call_operand.vmem [shape: f32[128,1], index: 6, kind: input, shape index: {}]   ;;  %s1029_s7 = inlined_call_operand.vmem [shape: bf16[1,128], index: 7, kind: input, shape index: {}]   ;;  %s1030_s8 = inlined_call_operand.<no memory space> [shape: f32[1,1], index: 8, kind: input, shape index: {}]   ;;  %s1031_s9 = inlined_call_operand.hbm [shape: f32[1,128], index: 9, kind: output, shape index: {}]  }
   0x1   :  { %v14_v0 = vstv %s1030_s8 }
   0x2   :  { %15 = vst [vmem:[#allocation2] sm:$0x1] %v14_v0 }
   0x3   :  { %v36_v1 = vld [vmem:[%s1022_s0] sm:$0xf]  ;;  %vm60_vm0 = vcmask 1042432   ;;  %vm61_vm1 = vcmask 1043456   ;;  %v832_v2 = vmov 0.0   ;;  %v833_v3 = vmov 65535  }
   0x4   :  { %675 = vmatprep.subr.bf16.mxu0 %v832_v2  ;;  %v62_v4 = vsel %vm60_vm0, 4294967295, %v833_v3  ;;  %681 = vmatprep.subr.bf16.mxu1 %v832_v2  ;;  %vm834_vm2 = vmmov 0   ;;  %v39_v6 = vld [vmem:[%s1024_s2] sm:$0xff]  ;;  %v835_v8 = vmov 0   ;;  %vm56_vm3 = vcmask 56320   ;;  %v40_v10 = vld [vmem:[%s1024_s2 + $0x8] sm:$0xff] }
   0x5   :  { %v63_v5 = vsel %vm61_vm1, %v62_v4, 0  ;;  %677 = vmatprep.mubr.msk.bf16.mxu0 %vm834_vm2, %v832_v2  ;;  %683 = vmatprep.mubr.msk.bf16.mxu1 %vm834_vm2, %v832_v2  ;;  %v733_v9 = vld [vmem:[%s1023_s1] sm:$0xff]   ;;  %v195_v11 = vld [vmem:[%s1028_s6 + $0x78] sm:$0xff] }
   0x6   :  { %v65_v7 = vand.u32 %v63_v5, %v36_v1  ;;  %731 = vset.pattern.permute.xlu0 %v835_v8  ;;  %732 = vset.pattern.permute.xlu1 %v835_v8 }
   0x7   :  { %43 = vperm.xlu0 %731, %v39_v6  }
   0x8   :  { %676 = vmatpush3.bf16.msra.mxu0 %v65_v7 }
   0xb   :  { %678 = vmatmul.mubr.msk.bf16.vlgmr.msra.gmra.mxu0 %vm56_vm3, %v733_v9  ;;  %48 = vperm.xlu0 %731, %v40_v10  }
   0xc   :  { %16 = vsyncpa [#allocation4], 0  ;;  %v193_v12 = vld [vmem:[%s1028_s6 + $0x68] sm:$0xff]  ;;  %v191_v13 = vld [vmem:[%s1028_s6 + $0x58] sm:$0xff]  ;;  %vm118_vm4 = vcmask 130048   ;;  %vm316_vm5 = vcmask 64512  }
   0xd   :  { %v189_v14 = vld [vmem:[%s1028_s6 + $0x48] sm:$0xff]  ;;  %v187_v15 = vld [vmem:[%s1028_s6 + $0x38] sm:$0xff]  ;;  %v112_v19 = vld [vmem:[%s1026_s4] sm:$0xff]  ;;  %s836_s17 = smov [#allocation3]  }
   0xe   :  { %v185_v16 = vld [vmem:[%s1028_s6 + $0x28] sm:$0xff]  ;;  %v183_v17 = vld [vmem:[%s1028_s6 + $0x18] sm:$0xff]  ;;  %115 = vperm.xlu1 %732, %v112_v19   ;;  %v194_v20 = vld [vmem:[%s1028_s6 + $0x70] sm:$0xff]  ;;  %s609_s4 = sshll.u32 %s836_s17, 4  ;;  %s610_s4 = int_to_ptr.vmem [resolvable:$true] %s609_s4 }
   0xf   :  { %273 = vperm.xlu0 %731, %v195_v11   ;;  %v181_v18 = vld [vmem:[%s1028_s6 + $0x8] sm:$0xff]  ;;  %v192_v21 = vld [vmem:[%s1028_s6 + $0x60] sm:$0xff]  ;;  %v190_v22 = vld [vmem:[%s1028_s6 + $0x50] sm:$0xff]  ;;  %s814_s18 = scalar_lea.vmem %s610_s4, 32  ;;  %p815_p1 = scmp.lt.s32.totalorder %s610_s4, %s610_s4 }
  0x10   :  { %v188_v23 = vld [vmem:[%s1028_s6 + $0x40] sm:$0xff]  ;;  %v186_v24 = vld [vmem:[%s1028_s6 + $0x30] sm:$0xff]  ;;  %v735_v51 = vld [vmem:[%s1027_s5 + $0x8] sm:$0xff]  }
  0x11   :  { %v184_v25 = vld [vmem:[%s1028_s6 + $0x20] sm:$0xff]  ;;  %v182_v26 = vld [vmem:[%s1028_s6 + $0x10] sm:$0xff]  ;;  %v737_v53 = vld [vmem:[%s1027_s5 + $0x18] sm:$0xff]  }
  0x12   :  { %268 = vperm.xlu1 %732, %v194_v20   ;;  %v180_v27 = vld [vmem:[%s1028_s6] sm:$0xff]  ;;  %v736_v52 = vld [vmem:[%s1027_s5 + $0x10] sm:$0xff]   ;;  %v739_v55 = vld [vmem:[%s1027_s5 + $0x28] sm:$0xff]  }
  0x13   :  { %263 = vperm.xlu0 %731, %v193_v12   ;;  %v546_v28 = vld [vmem:[#allocation2] sm:$0x1]  ;;  %v740_v56 = vld [vmem:[%s1027_s5 + $0x30] sm:$0xff]   ;;  %v741_v57 = vld [vmem:[%s1027_s5 + $0x38] sm:$0xff]  }
  0x14   :  { %v110_v40 = vld [vmem:[%s1025_s3] sm:$0xf] }
  0x15   :  { %v734_v41 = vld [vmem:[%s1027_s5] sm:$0xff]  }
  0x16   :  { %258 = vperm.xlu1 %732, %v192_v21   ;;  %689 = vmatprep.mubr.msk.bf16.mxu0 %vm316_vm5, %v734_v41  ;;  %v738_v54 = vld [vmem:[%s1027_s5 + $0x20] sm:$0xff]  }
  0x17   :  { %253 = vperm.xlu0 %731, %v191_v13  }
  0x1a   :  { %248 = vperm.xlu1 %732, %v190_v22  }
  0x1b   :  { %243 = vperm.xlu0 %731, %v189_v14  }
  0x1e   :  { %238 = vperm.xlu1 %732, %v188_v23  }
  0x1f   :  { %233 = vperm.xlu0 %731, %v187_v15  }
  0x22   :  { %228 = vperm.xlu1 %732, %v186_v24  }
  0x23   :  { %223 = vperm.xlu0 %731, %v185_v16  }
  0x26   :  { %218 = vperm.xlu1 %732, %v184_v25  }
  0x27   :  { %213 = vperm.xlu0 %731, %v183_v17  }
  0x2a   :  { %208 = vperm.xlu1 %732, %v182_v26  }
  0x2b   :  { %203 = vperm.xlu0 %731, %v181_v18  }
  0x2e   :  { %198 = vperm.xlu1 %732, %v180_v27  }
  0x32   :  { %549 = vperm.xlu1 %732, %v546_v28  }
  0x82   :  { %v44_v29 = vpop.permute.xlu0 %43 }
  0x86   :  { %v49_v33 = vpop.permute.xlu0 %48 }
  0x89   :  { %v116_v42 = vpop.permute.xlu1 %115 }
  0x8a   :  { %v274_v60 = vpop.permute.xlu0 %273 }
  0x8d   :  { %v269_v62 = vpop.permute.xlu1 %268 }
  0x8e   :  { %v264_v1 = vpop.permute.xlu0 %263 }
  0x91   :  { %v259_v4 = vpop.permute.xlu1 %258 }
  0x92   :  { %v254_v7 = vpop.permute.xlu0 %253 }
  0x95   :  { %v249_v9 = vpop.permute.xlu1 %248 }
  0x96   :  { %v244_v12 = vpop.permute.xlu0 %243 }
  0x99   :  { %v239_v14 = vpop.permute.xlu1 %238 }
  0x9a   :  { %v234_v21 = vpop.permute.xlu0 %233 }
  0x9d   :  { %v229_v25 = vpop.permute.xlu1 %228 }
  0xcb   :  { %v101_v30 = vpop.f32.mrf.mxu0 }
  0xcc   :  { %v102_v32 = vadd.f32 %v101_v30, %v44_v29 }
  0xcd   :  { %v679_v31 = vpop.f32.mrf.mxu0 }
  0xce   :  { %v108_v37 = vmax.f32 %v102_v32, 0.0 }
  0xcf   :  { %v104_v34 = vpop.f32.mrf.mxu0 }
  0xd0   :  { %v105_v35 = vadd.f32 %v104_v34, %v49_v33  ;;  %v224_v33 = vpop.permute.xlu0 %223 }
  0xd1   :  { %v680_v36 = vpop.f32.mrf.mxu0 }
  0xd2   :  { %v109_v38 = vmax.f32 %v105_v35, 0.0  ;;  %v219_v36 = vpop.permute.xlu1 %218 }
  0xd4   :  { %v111_v39 = vpack.c.bf16 %v109_v38, %v108_v37 }
  0xd6   :  { %682 = vmatpush3.bf16.msra.mxu1 %v111_v39 }
  0xd7   :  { %705 = vmatprep.subr.bf16.mxu1 %v832_v2 }
  0xd9   :  { %684 = vmatmul.mubr.msk.bf16.vlgmr.msra.gmra.mxu1 %vm118_vm4, %v110_v40 }
  0xda   :  { %721 = vmatprep.mubr.msk.bf16.mxu1 %vm834_vm2, %v832_v2 }
 0x199   :  { %v156_v43 = vpop.f32.mrf.mxu1 }
 0x19a   :  { %v157_v44 = vadd.f32 %v156_v43, %v116_v42  ;;  %v214_v42 = vpop.permute.xlu0 %213 }
 0x19b   :  { %v685_v45 = vpop.f32.mrf.mxu1 }
 0x19c   :  { %v162_v46 = vmax.f32 %v157_v44, 0.0  ;;  %v209_v45 = vpop.permute.xlu1 %208 }
 0x19d   :  { %v159_v47 = vpop.f32.mrf.mxu1 }
 0x19e   :  { %v179_v48 = vpack.c.bf16 %v162_v46, %v162_v46 }
 0x19f   :  { %v686_v49 = vpop.f32.mrf.mxu1 }
 0x1a0   :  { %725 = vmatprep.subr.msk.bf16.mxu0 %vm61_vm1, %v179_v48  ;;  %v342_v50 = vsel %vm61_vm1, %v179_v48, 0 }
 0x1a1   :  { %688 = vmatpush3.bf16.msra.mxu0 %v342_v50 }
 0x1a4   :  { %690 = vmatmul.mubr.msk.bf16.vlgmr.msra.gmra.mxu0 %vm316_vm5, %v735_v51 }
 0x1a5   :  { %693 = vmatprep.mubr.msk.bf16.mxu0 %vm316_vm5, %v736_v52 }
 0x1ac   :  { %694 = vmatmul.mubr.msk.bf16.gmra.mxu0 %vm316_vm5, %v737_v53 }
 0x1ad   :  { %697 = vmatprep.mubr.msk.bf16.mxu0 %vm316_vm5, %v738_v54  ;;  %v204_v54 = vpop.permute.xlu0 %203 }
 0x1b4   :  { %698 = vmatmul.mubr.msk.bf16.gmra.mxu0 %vm316_vm5, %v739_v55 }
 0x1b5   :  { %701 = vmatprep.mubr.msk.bf16.mxu0 %vm316_vm5, %v740_v56 }
 0x1bc   :  { %702 = vmatmul.mubr.msk.bf16.gmra.mxu0 %vm316_vm5, %v741_v57 }
 0x264   :  { %v1000_v58 = vpop.f32.mrf.mxu0 }
 0x265   :  { %v387_v51 = vadd.f32 %v1000_v58, %v209_v45 }
 0x266   :  { %v1002_v59 = vpop.f32.mrf.mxu0 }
 0x268   :  { %v692_v61 = vpop.f32.mrf.mxu0 }
 0x269   :  { %v390_v48 = vadd.f32 %v692_v61, %v214_v42  ;;  %v638_v61 = vmul.f32 -1.442695, %v387_v51 }
 0x26a   :  { %v1004_v63 = vpop.f32.mrf.mxu0 }
 0x26b   :  { %v639_v56 = vmul.f32 -1.442695, %v390_v48  ;;  %v382_v57 = vadd.f32 %v1004_v63, %v204_v54 }
 0x26c   :  { %v695_v0 = vpop.f32.mrf.mxu0 }
 0x26d   :  { %v403_v39 = vadd.f32 %v695_v0, %v229_v25 }
 0x26e   :  { %v394_v3 = vpop.f32.mrf.mxu0 }
 0x26f   :  { %v395_v41 = vadd.f32 %v394_v3, %v219_v36  ;;  %v642_v46 = vmul.f32 -1.442695, %v403_v39 }
 0x270   :  { %v696_v5 = vpop.f32.mrf.mxu0 }
 0x271   :  { %v406_v37 = vadd.f32 %v696_v5, %v234_v21  ;;  %v640_v49 = vmul.f32 -1.442695, %v395_v41 }
 0x272   :  { %v397_v6 = vpop.f32.mrf.mxu0 }
 0x273   :  { %v643_v43 = vmul.f32 -1.442695, %v406_v37  ;;  %v398_v44 = vadd.f32 %v397_v6, %v224_v33  ;;  %v637_v6 = vmul.f32 -1.442695, %v382_v57 }
 0x274   :  { %v699_v8 = vpop.f32.mrf.mxu0 }
 0x275   :  { %v419_v26 = vadd.f32 %v699_v8, %v249_v9  ;;  %v641_v50 = vmul.f32 -1.442695, %v398_v44 }
 0x276   :  { %v410_v10 = vpop.f32.mrf.mxu0 }
 0x277   :  { %v646_v34 = vmul.f32 -1.442695, %v419_v26  ;;  %v411_v35 = vadd.f32 %v410_v10, %v239_v14 }
 0x278   :  { %v700_v11 = vpop.f32.mrf.mxu0 }
 0x279   :  { %v422_v18 = vadd.f32 %v700_v11, %v254_v7  ;;  %v644_v40 = vmul.f32 -1.442695, %v411_v35 }
 0x27a   :  { %v413_v13 = vpop.f32.mrf.mxu0 }
 0x27b   :  { %v647_v28 = vmul.f32 -1.442695, %v422_v18  ;;  %v414_v31 = vadd.f32 %v413_v13, %v244_v12 }
 0x27c   :  { %v703_v15 = vpop.f32.mrf.mxu0 }
 0x27d   :  { %v435_v16 = vadd.f32 %v703_v15, %v269_v62  ;;  %v645_v38 = vmul.f32 -1.442695, %v414_v31  ;;  %v199_v62 = vpop.permute.xlu1 %198 }
 0x27e   :  { %v426_v17 = vpop.f32.mrf.mxu0  ;;  %v379_v3 = vadd.f32 %v1002_v59, %v199_v62 }
 0x27f   :  { %v650_v19 = vmul.f32 -1.442695, %v435_v16  ;;  %v427_v20 = vadd.f32 %v426_v17, %v259_v4 }
 0x280   :  { %v704_v22 = vpop.f32.mrf.mxu0  ;;  %v636_v63 = vmul.f32 -1.442695, %v379_v3 }
 0x281   :  { %v648_v23 = vmul.f32 -1.442695, %v427_v20  ;;  %v438_v24 = vadd.f32 %v704_v22, %v274_v60  ;;  %742 = vpow2.f32 %v650_v19 }
 0x282   :  { %v429_v27 = vpop.f32.mrf.mxu0 }
 0x283   :  { %v651_v29 = vmul.f32 -1.442695, %v438_v24  ;;  %v430_v30 = vadd.f32 %v429_v27, %v264_v1  ;;  %744 = vpow2.f32 %v648_v23 }
 0x285   :  { %v649_v32 = vmul.f32 -1.442695, %v430_v30  ;;  %746 = vpow2.f32 %v651_v29 }
 0x286   :  { %748 = vpow2.f32 %v647_v28 }
 0x287   :  { %750 = vpow2.f32 %v649_v32 }
 0x288   :  { %752 = vpow2.f32 %v646_v34 }
 0x289   :  { %754 = vpow2.f32 %v645_v38 }
 0x28a   :  { %756 = vpow2.f32 %v644_v40 }
 0x28b   :  { %758 = vpow2.f32 %v643_v43 }
 0x28c   :  { %760 = vpow2.f32 %v642_v46 }
 0x28d   :  { %762 = vpow2.f32 %v640_v49 }
 0x28e   :  { %v743_v47 = vpop.eup %742  ;;  %764 = vpow2.f32 %v641_v50 }
 0x28f   :  { %v503_v52 = vadd.f32 1.0, %v743_v47 }
 0x290   :  { %v745_v53 = vpop.eup %744 }
 0x291   :  { %766 = vrcp.f32 %v503_v52  ;;  %v501_v4 = vadd.f32 1.0, %v745_v53  ;;  %v537_v52 = vld [vmem:[%s1029_s7] sm:$0x1]  ;;  %v552_v53 = vlaneseq  ;;  %s810_s7 = scalar_lea.vmem %s610_s4, 16 }
 0x292   :  { %v747_v55 = vpop.eup %746  ;;  %p811_p0 = scmp.ne.s32.totalorder %s610_s4, %s810_s7  ;;  %p816_p2 = scmp.lt.s32.totalorder %s814_s18, %s810_s7 }
 0x293   :  { %v749_v60 = vpop.eup %748  ;;  %v504_v0 = vadd.f32 1.0, %v747_v55  ;;  %v553_v54 = vshrl.u32 %v552_v53, 7 }
 0x294   :  { %v751_v1 = vpop.eup %750  ;;  %v500_v7 = vadd.f32 1.0, %v749_v60  ;;  %p817_p3 = por %p816_p2, %p815_p1 }
 0x295   :  { %768 = vrcp.f32 %v504_v0  ;;  %v502_v58 = vadd.f32 1.0, %v751_v1  ;;  %v753_v5 = vpop.eup %752  ;;  %v554_v55 = vsub.s32 0, %v553_v54 }
 0x296   :  { %770 = vpow2.f32 %v639_v56  ;;  %v755_v8 = vpop.eup %754  ;;  %v499_v9 = vadd.f32 1.0, %v753_v5  ;;  %v550_v56 = vpop.permute.xlu1 %549  ;;  %p818_p4 = pnand %p817_p3, %p811_p0 }
 0x297   :  { %772 = vrcp.f32 %v502_v58  ;;  %v757_v10 = vpop.eup %756  ;;  %v498_v11 = vadd.f32 1.0, %v755_v8  ;;  %v555_v57 = vrot.slane %v550_v56, %v554_v55 }
 0x298   :  { %774 = vpow2.f32 %v638_v61  ;;  %v759_v12 = vpop.eup %758  ;;  %v497_v59 = vadd.f32 1.0, %v757_v10 }
 0x299   :  { %776 = vrcp.f32 %v501_v4  ;;  %v761_v13 = vpop.eup %760  ;;  %v496_v15 = vadd.f32 1.0, %v759_v12 }
 0x29a   :  { %778 = vpow2.f32 %v637_v6  ;;  %v763_v14 = vpop.eup %762  ;;  %v495_v18 = vadd.f32 1.0, %v761_v13 }
 0x29b   :  { %780 = vrcp.f32 %v500_v7  ;;  %v765_v16 = vpop.eup %764  ;;  %v493_v25 = vadd.f32 1.0, %v763_v14 }
 0x29c   :  { %782 = vpow2.f32 %v636_v63  ;;  %v494_v21 = vadd.f32 1.0, %v765_v16 }
 0x29d   :  { %784 = vrcp.f32 %v499_v9 }
 0x29e   :  { %786 = vrcp.f32 %v498_v11  ;;  %v767_v17 = vpop.eup %766 }
 0x29f   :  { %788 = vrcp.f32 %v497_v59 }
 0x2a0   :  { %790 = vrcp.f32 %v496_v15 }
 0x2a1   :  { %792 = vrcp.f32 %v495_v18 }
 0x2a2   :  { %v769_v19 = vpop.eup %768  ;;  %794 = vrcp.f32 %v494_v21 }
 0x2a3   :  { %v771_v20 = vpop.eup %770  ;;  %v545_v22 = vpack.c.bf16 %v769_v19, %v767_v17  ;;  %796 = vrcp.f32 %v493_v25 }
 0x2a4   :  { %v773_v23 = vpop.eup %772  ;;  %v492_v28 = vadd.f32 1.0, %v771_v20 }
 0x2a5   :  { %v775_v24 = vpop.eup %774  ;;  %706 = vmatpush3.bf16.msra.mxu1 %v545_v22 }
 0x2a6   :  { %v777_v26 = vpop.eup %776  ;;  %707 = vmatprep.subr.bf16.mxu1 %v832_v2  ;;  %v491_v32 = vadd.f32 1.0, %v775_v24  ;;  %798 = vrcp.f32 %v492_v28 }
 0x2a7   :  { %v779_v27 = vpop.eup %778  ;;  %v544_v29 = vpack.c.bf16 %v773_v23, %v777_v26 }
 0x2a8   :  { %v781_v30 = vpop.eup %780  ;;  %v490_v34 = vadd.f32 1.0, %v779_v27  ;;  %800 = vrcp.f32 %v491_v32 }
 0x2a9   :  { %v783_v31 = vpop.eup %782  ;;  %708 = vmatpush3.bf16.msra.mxu1 %v544_v29 }
 0x2aa   :  { %v785_v33 = vpop.eup %784  ;;  %709 = vmatprep.subr.bf16.mxu1 %v832_v2  ;;  %v489_v37 = vadd.f32 1.0, %v783_v31  ;;  %802 = vrcp.f32 %v490_v34 }
 0x2ab   :  { %v543_v35 = vpack.c.bf16 %v781_v30, %v785_v33  ;;  %v787_v36 = vpop.eup %786 }
 0x2ac   :  { %v789_v38 = vpop.eup %788  ;;  %804 = vrcp.f32 %v489_v37 }
 0x2ad   :  { %710 = vmatpush3.bf16.msra.mxu1 %v543_v35  ;;  %v542_v39 = vpack.c.bf16 %v787_v36, %v789_v38  ;;  %v791_v40 = vpop.eup %790 }
 0x2ae   :  { %711 = vmatprep.subr.bf16.mxu1 %v832_v2  ;;  %v793_v41 = vpop.eup %792 }
 0x2af   :  { %v541_v42 = vpack.c.bf16 %v791_v40, %v793_v41  ;;  %v795_v43 = vpop.eup %794 }
 0x2b0   :  { %v797_v44 = vpop.eup %796 }
 0x2b1   :  { %712 = vmatpush3.bf16.msra.mxu1 %v542_v39  ;;  %v540_v45 = vpack.c.bf16 %v795_v43, %v797_v44 }
 0x2b2   :  { %713 = vmatprep.subr.bf16.mxu1 %v832_v2 }
 0x2b3   :  { %v799_v46 = vpop.eup %798 }
 0x2b5   :  { %714 = vmatpush3.bf16.msra.mxu1 %v541_v42  ;;  %v801_v47 = vpop.eup %800 }
 0x2b6   :  { %715 = vmatprep.subr.bf16.mxu1 %v832_v2  ;;  %v539_v48 = vpack.c.bf16 %v799_v46, %v801_v47 }
 0x2b7   :  { %v803_v49 = vpop.eup %802 }
 0x2b9   :  { %716 = vmatpush3.bf16.msra.mxu1 %v540_v45  ;;  %v805_v50 = vpop.eup %804 }
 0x2ba   :  { %717 = vmatprep.subr.bf16.mxu1 %v832_v2  ;;  %v538_v51 = vpack.c.bf16 %v803_v49, %v805_v50 }
 0x2bd   :  { %718 = vmatpush3.bf16.msra.mxu1 %v539_v48 }
 0x2be   :  { %719 = vmatprep.subr.bf16.mxu1 %v832_v2 }
 0x2c1   :  { %720 = vmatpush3.bf16.msra.mxu1 %v538_v51 }
 0x2c4   :  { %722 = vmatmul.mubr.bf16.vlgmr.msra.gmra.mxu1 %v537_v52 }
 0x384   :  { %v590_v60 = vpop.f32.mrf.mxu1 }
 0x385   :  { %v591_v62 = vadd.f32 %v590_v60, %v555_v57 }
 0x386   :  { %v723_v0 = vpop.f32.mrf.mxu1 }
 0x387   :  { %v652_v1 = vmul.f32 -1.442695, %v591_v62 }
 0x388   :  { %v593_v61 = vpop.f32.mrf.mxu1 }
 0x389   :  { %806 = vpow2.f32 %v652_v1 }
 0x38a   :  { %v724_v3 = vpop.f32.mrf.mxu1 }
 0x396   :  { %v807_v2 = vpop.eup %806 }
 0x397   :  { %v599_v4 = vadd.f32 1.0, %v807_v2 }
 0x399   :  { %808 = vrcp.f32 %v599_v4 }
 0x3a6   :  { %v809_v58 = vpop.eup %808 }
 0x3a7   :  { %602 = vst [vmem:[#allocation3] sm:$0x1] %v809_v58 }
 0x3a8   :  { %821 = shalt.err (!%p818_p4)
}
 0x3a9   :  { %612 = dma.vmem_to_hbm [thread:$0]  %s610_s4, 16, %s1031_s9, [#allocation4]  }
 0x3aa   :  { %830 = dma.done.wait [#allocation4], 16  }
 0x3ab   :  { %831 = vsyncadd [#allocation4], 4294967280 }
 0x3ac   :  { %616 = vsyncpa [#allocation4], 1 }

</bundles_post_ra>
